<compile_context>
chip_gen: v7x
topology: tpu7x:2x2x1
jax: 0.10.0
libtpu: 0.0.40
codegen_flags: <defaults>
</compile_context>

<pallas_src>
import functools

import jax
import jax.numpy as jnp
from jax.experimental import pallas as pl
from jax.experimental.pallas import tpu as pltpu

WIN = 9                     # window size per spatial dim (module default)
PAD = WIN // 2              # 'same' padding / band half-width


def ncc_kernel(a_ref, b_ref, i_ref, j_ref, out_ref, *, precision):
    # a_ref: [H, H], b_ref: [W, W] banded 0/1 matrices (both symmetric).
    # i_ref, j_ref: [NB, H, W] block of y_true / y_pred images.
    # out_ref: [8, 128] lane-dense tile; the partial cc-sum goes in [0, 0].
    A = a_ref[...]
    Bm = b_ref[...]
    I = i_ref[...]
    J = j_ref[...]
    NB, H, W = i_ref.shape
    C = 5 * NB

    # Five filter inputs stacked along the leading axis: [5*NB, H, W].
    X = jnp.concatenate([I, J, I * I, J * J, I * J], axis=0)

    # W pass: one fat MXU matmul for every channel of every image in the block.
    T = jnp.dot(X.reshape(C * H, W), Bm,
                preferred_element_type=jnp.float32,
                precision=precision)                           # [C*H, W]

    # H pass: transpose each HxW block (XLU slot) and right-multiply by the
    # symmetric A: (A @ M) == (M^T @ A)^T.  Leave results transposed; all the
    # remaining math is elementwise + a global sum, so layout is irrelevant.
    Tt = jnp.swapaxes(T.reshape(C, H, W), 1, 2).reshape(C * W, H)
    S = jnp.dot(Tt, A,
                preferred_element_type=jnp.float32,
                precision=precision)                           # [C*W, H]

    S5 = S.reshape(5, NB * W, H)
    I_sum, J_sum, I2_sum, J2_sum, IJ_sum = S5[0], S5[1], S5[2], S5[3], S5[4]

    inv_win = 1.0 / float(WIN * WIN)
    # Algebraically identical to the reference's u_I / u_J formulation.
    cross = IJ_sum - I_sum * J_sum * inv_win
    I_var = I2_sum - I_sum * I_sum * inv_win
    J_var = J2_sum - J_sum * J_sum * inv_win

    # divide -> EUP approx reciprocal (free slot) + VALU multiply
    cc = (cross * cross) * pl.reciprocal(I_var * J_var + 1e-5, approx=True)
    partial = jnp.sum(cc)

    # Lane-dense (8,128) writeback: unmasked vst, partial in element [0, 0].
    row = jax.lax.broadcasted_iota(jnp.int32, (8, 128), 0)
    lane = jax.lax.broadcasted_iota(jnp.int32, (8, 128), 1)
    out_ref[...] = jnp.where((row == 0) & (lane == 0), partial, 0.0)


def _banded_ones(n):
    r = jnp.arange(n, dtype=jnp.int32)
    return (jnp.abs(r[:, None] - r[None, :]) <= PAD).astype(jnp.float32)


def _vmem_limit_bytes():
    # Derive the scoped-VMEM budget from the hardware instead of hardcoding:
    # ~3/4 of physical VMEM (v7x: 64 MiB -> 48 MiB; v5e/v6e: 128 MiB -> 96 MiB).
    try:
        cap = int(pltpu.get_tpu_info().vmem_capacity_bytes)
    except Exception:
        cap = 64 * 1024 * 1024          # conservative: fits every generation
    return min((cap * 3) // 4, 100 * 1024 * 1024)


def _choose_batch_block(N, H, W, vmem_limit):
    # Pack enough images that the W-pass matmul has >= ~512 rows (M dim),
    # stay well inside the VMEM budget, and (when N > 1) keep >= 2 grid steps.
    nb = max(1, -(-512 // (5 * H)))
    bytes_per_image = 16 * H * W * 4        # ~live f32 slabs per image in-flight
    nb = min(nb, max(1, (vmem_limit // 2) // bytes_per_image))
    nb = min(nb, N)
    if N > 1:
        nb = min(nb, -(-N // 2))
    return max(nb, 1)


def _ncc_pallas_call(A, Bm, I, J, nb, grid_len, vmem_limit,
                     single_buffer_bands, precision):
    H = A.shape[0]
    W = Bm.shape[0]
    band_kwargs = (
        {"pipeline_mode": pl.Buffered(1)} if single_buffer_bands else {})
    return pl.pallas_call(
        functools.partial(ncc_kernel, precision=precision),
        out_shape=jax.ShapeDtypeStruct((grid_len, 8, 128), jnp.float32),
        grid=(grid_len,),
        in_specs=[
            # band matrices: constant block index -> fetched once, resident
            pl.BlockSpec((H, H), lambda n: (0, 0), **band_kwargs),
            pl.BlockSpec((W, W), lambda n: (0, 0), **band_kwargs),
            # image blocks: one [nb, H, W] slab per grid step
            pl.BlockSpec((nb, H, W), lambda n: (n, 0, 0)),
            pl.BlockSpec((nb, H, W), lambda n: (n, 0, 0)),
        ],
        out_specs=pl.BlockSpec((None, 8, 128), lambda n: (n, 0, 0)),
        compiler_params=pltpu.CompilerParams(
            dimension_semantics=("parallel",),     # megacore-shard the batch
            vmem_limit_bytes=vmem_limit,
        ),
    )(A, Bm, I, J)


def ncc_loss(y_pred, y_true):
    assert y_pred.shape == y_true.shape
    N, C, H, W = y_pred.shape
    assert C == 1, "NCC reference conv uses a single-channel [1,1,9,9] filter"

    I = y_true.astype(jnp.float32).reshape(N, H, W)
    J = y_pred.astype(jnp.float32).reshape(N, H, W)

    vmem_limit = _vmem_limit_bytes()
    nb = _choose_batch_block(N, H, W, vmem_limit)
    grid_len = -(-N // nb)
    n_pad = grid_len * nb
    if n_pad != N:
        # zero-padded images contribute exactly 0 to the cc sum
        I = jnp.pad(I, ((0, n_pad - N), (0, 0), (0, 0)))
        J = jnp.pad(J, ((0, n_pad - N), (0, 0), (0, 0)))

    A = _banded_ones(H)              # [H, H] row-pass operator
    Bm = _banded_ones(W)             # [W, W] column-pass operator

    # Preferred config first; fall back if this jax version rejects
    # pipeline_mode=Buffered(1) or Precision.HIGH in the Mosaic lowering.
    configs = (
        (True, jax.lax.Precision.HIGH),
        (False, jax.lax.Precision.HIGH),
        (False, jax.lax.Precision.HIGHEST),
    )
    partials = None
    last_err = None
    for single_buf, prec in configs:
        try:
            partials = _ncc_pallas_call(
                A, Bm, I, J, nb, grid_len, vmem_limit, single_buf, prec)
            jax.block_until_ready(partials)
            break
        except Exception as e:          # noqa: BLE001 - feature-gate fallback
            last_err = e
            partials = None
    if partials is None:
        raise last_err

    # mean over all N * 1 * H * W elements, matching torch.mean(cc)
    return 1.0 - jnp.sum(partials) / float(N * H * W)


def ncc_ref(y_pred, y_true):
    # pure-JAX reference mirroring the PyTorch module (F.conv2d path)
    I = y_true.astype(jnp.float32)
    J = y_pred.astype(jnp.float32)
    filt = jnp.ones((1, 1, WIN, WIN), jnp.float32)

    def conv(x):
        return jax.lax.conv_general_dilated(
            x, filt, window_strides=(1, 1),
            padding=[(PAD, PAD), (PAD, PAD)],
            dimension_numbers=("NCHW", "OIHW", "NCHW"),
            precision=jax.lax.Precision.HIGHEST)

    I_sum, J_sum = conv(I), conv(J)
    I2_sum, J2_sum, IJ_sum = conv(I * I), conv(J * J), conv(I * J)
    win_size = float(WIN * WIN)
    u_I = I_sum / win_size
    u_J = J_sum / win_size
    cross = IJ_sum - u_J * I_sum - u_I * J_sum + u_I * u_J * win_size
    I_var = I2_sum - 2 * u_I * I_sum + u_I * u_I * win_size
    J_var = J2_sum - 2 * u_J * J_sum + u_J * u_J * win_size
    cc = cross * cross / (I_var * J_var + 1e-5)
    return 1.0 - jnp.mean(cc)


if __name__ == "__main__":
    key = jax.random.PRNGKey(0)
    k1, k2 = jax.random.split(key)
    y_pred = jax.random.normal(k1, (2, 1, 16, 16), dtype=jnp.float32)
    y_true = jax.random.normal(k2, (2, 1, 16, 16), dtype=jnp.float32)

    loss = ncc_loss(y_pred, y_true)
    jax.block_until_ready(loss)

    ref = ncc_ref(y_pred, y_true)
    assert jnp.allclose(loss, ref, atol=2e-4, rtol=2e-4), (loss, ref)
    print("KERNEL_OK")
</pallas_src>

<mosaic_0001>
module attributes {stable_mosaic.version = 11 : i64} {
  func.func @ncc_kernel(%arg0: i32, %arg1: memref<16x16xf32, #tpu.memory_space<vmem>>, %arg2: memref<16x16xf32, #tpu.memory_space<vmem>>, %arg3: memref<1x16x16xf32, #tpu.memory_space<vmem>>, %arg4: memref<1x16x16xf32, #tpu.memory_space<vmem>>, %arg5: memref<1x8x128xf32, #tpu.memory_space<vmem>>) attributes {dimension_semantics = [#tpu.dimension_semantics<parallel>], iteration_bounds = array<i64: 2>, scalar_prefetch = 0 : i64, scratch_operands = 0 : i64, tpu.core_type = #tpu.core_type<tc>, window_params = [{pipeline_mode = #tpu.pipeline_mode<synchronous>, transform_indices = @transform_0, window_bounds = array<i64: 16, 16>}, {pipeline_mode = #tpu.pipeline_mode<synchronous>, transform_indices = @transform_1, window_bounds = array<i64: 16, 16>}, {transform_indices = @transform_2, window_bounds = array<i64: 1, 16, 16>}, {transform_indices = @transform_3, window_bounds = array<i64: 1, 16, 16>}, {transform_indices = @transform_4, window_bounds = array<i64: 1, 8, 128>}]} {
    %c0 = arith.constant 0 : index
    %c0_0 = arith.constant 0 : index
    %0 = vector.load %arg1[%c0, %c0_0] : memref<16x16xf32, #tpu.memory_space<vmem>>, vector<16x16xf32>
    %c0_1 = arith.constant 0 : index
    %c0_2 = arith.constant 0 : index
    %1 = vector.load %arg2[%c0_1, %c0_2] : memref<16x16xf32, #tpu.memory_space<vmem>>, vector<16x16xf32>
    %c0_3 = arith.constant 0 : index
    %c0_4 = arith.constant 0 : index
    %c0_5 = arith.constant 0 : index
    %2 = vector.load %arg3[%c0_3, %c0_4, %c0_5] : memref<1x16x16xf32, #tpu.memory_space<vmem>>, vector<1x16x16xf32>
    %c0_6 = arith.constant 0 : index
    %c0_7 = arith.constant 0 : index
    %c0_8 = arith.constant 0 : index
    %3 = vector.load %arg4[%c0_6, %c0_7, %c0_8] : memref<1x16x16xf32, #tpu.memory_space<vmem>>, vector<1x16x16xf32>
    %4 = arith.mulf %2, %2 : vector<1x16x16xf32>
    %5 = arith.mulf %3, %3 : vector<1x16x16xf32>
    %6 = arith.mulf %2, %3 : vector<1x16x16xf32>
    %7 = tpu.concatenate %2, %3, %4, %5, %6 in 0 : vector<1x16x16xf32>, vector<1x16x16xf32>, vector<1x16x16xf32>, vector<1x16x16xf32>, vector<1x16x16xf32> -> vector<5x16x16xf32>
    %8 = vector.shape_cast %7 : vector<5x16x16xf32> to vector<80x16xf32>
    %cst = arith.constant dense<0.000000e+00> : vector<80x16xf32>
    %9 = tpu.matmul %8, %1, %cst {dimension_numbers = #tpu.dot_dimension_numbers<[1], [0], [0], [1], [0, 0, 1, 1], [], []>, precision = #tpu.contract_precision<fp32>} : vector<80x16xf32>, vector<16x16xf32>, vector<80x16xf32> -> vector<80x16xf32>
    %10 = vector.shape_cast %9 : vector<80x16xf32> to vector<5x16x16xf32>
    %11 = tpu.transpose %10, [0, 2, 1] : vector<5x16x16xf32> -> vector<5x16x16xf32>
    %12 = vector.shape_cast %11 : vector<5x16x16xf32> to vector<80x16xf32>
    %cst_9 = arith.constant dense<0.000000e+00> : vector<80x16xf32>
    %13 = tpu.matmul %12, %0, %cst_9 {dimension_numbers = #tpu.dot_dimension_numbers<[1], [0], [0], [1], [0, 0, 1, 1], [], []>, precision = #tpu.contract_precision<fp32>} : vector<80x16xf32>, vector<16x16xf32>, vector<80x16xf32> -> vector<80x16xf32>
    %14 = vector.shape_cast %13 : vector<80x16xf32> to vector<5x16x16xf32>
    %15 = vector.extract_strided_slice %14 {offsets = [0, 0, 0], sizes = [1, 16, 16], strides = [1, 1, 1]} : vector<5x16x16xf32> to vector<1x16x16xf32>
    %16 = vector.shape_cast %15 : vector<1x16x16xf32> to vector<16x16xf32>
    %17 = vector.extract_strided_slice %14 {offsets = [1, 0, 0], sizes = [1, 16, 16], strides = [1, 1, 1]} : vector<5x16x16xf32> to vector<1x16x16xf32>
    %18 = vector.shape_cast %17 : vector<1x16x16xf32> to vector<16x16xf32>
    %19 = vector.extract_strided_slice %14 {offsets = [2, 0, 0], sizes = [1, 16, 16], strides = [1, 1, 1]} : vector<5x16x16xf32> to vector<1x16x16xf32>
    %20 = vector.shape_cast %19 : vector<1x16x16xf32> to vector<16x16xf32>
    %21 = vector.extract_strided_slice %14 {offsets = [3, 0, 0], sizes = [1, 16, 16], strides = [1, 1, 1]} : vector<5x16x16xf32> to vector<1x16x16xf32>
    %22 = vector.shape_cast %21 : vector<1x16x16xf32> to vector<16x16xf32>
    %23 = vector.extract_strided_slice %14 {offsets = [4, 0, 0], sizes = [1, 16, 16], strides = [1, 1, 1]} : vector<5x16x16xf32> to vector<1x16x16xf32>
    %24 = vector.shape_cast %23 : vector<1x16x16xf32> to vector<16x16xf32>
    %25 = arith.mulf %16, %18 : vector<16x16xf32>
    %cst_10 = arith.constant 0.0123456791 : f32
    %26 = vector.broadcast %cst_10 : f32 to vector<16x16xf32>
    %27 = arith.mulf %25, %26 : vector<16x16xf32>
    %28 = arith.subf %24, %27 : vector<16x16xf32>
    %29 = arith.mulf %16, %16 : vector<16x16xf32>
    %cst_11 = arith.constant 0.0123456791 : f32
    %30 = vector.broadcast %cst_11 : f32 to vector<16x16xf32>
    %31 = arith.mulf %29, %30 : vector<16x16xf32>
    %32 = arith.subf %20, %31 : vector<16x16xf32>
    %33 = arith.mulf %18, %18 : vector<16x16xf32>
    %cst_12 = arith.constant 0.0123456791 : f32
    %34 = vector.broadcast %cst_12 : f32 to vector<16x16xf32>
    %35 = arith.mulf %33, %34 : vector<16x16xf32>
    %36 = arith.subf %22, %35 : vector<16x16xf32>
    %37 = arith.mulf %28, %28 : vector<16x16xf32>
    %38 = arith.mulf %32, %36 : vector<16x16xf32>
    %cst_13 = arith.constant 9.99999974E-6 : f32
    %39 = vector.broadcast %cst_13 : f32 to vector<16x16xf32>
    %40 = arith.addf %38, %39 : vector<16x16xf32>
    %41 = tpu.reciprocal %40 {approx = true} : vector<16x16xf32> -> vector<16x16xf32>
    %42 = arith.mulf %37, %41 : vector<16x16xf32>
    %43 = vector.shape_cast %42 : vector<16x16xf32> to vector<1x16x16xf32>
    %cst_14 = arith.constant dense<0.000000e+00> : vector<1xf32>
    %44 = vector.multi_reduction <add>, %43, %cst_14 [1, 2] : vector<1x16x16xf32> to vector<1xf32>
    %45 = vector.shape_cast %44 : vector<1xf32> to vector<1x1x1xf32>
    %46 = vector.extract %45[0, 0, 0] : f32 from vector<1x1x1xf32>
    %47 = tpu.iota {dimensions = array<i32: 0>} : vector<8x128xi32>
    %48 = tpu.iota {dimensions = array<i32: 1>} : vector<8x128xi32>
    %c0_i32 = arith.constant 0 : i32
    %49 = vector.broadcast %c0_i32 : i32 to vector<8x128xi32>
    %50 = arith.cmpi eq, %47, %49 : vector<8x128xi32>
    %c0_i32_15 = arith.constant 0 : i32
    %51 = vector.broadcast %c0_i32_15 : i32 to vector<8x128xi32>
    %52 = arith.cmpi eq, %48, %51 : vector<8x128xi32>
    %53 = arith.andi %50, %52 : vector<8x128xi1>
    %cst_16 = arith.constant 0.000000e+00 : f32
    %54 = vector.broadcast %46 : f32 to vector<8x128xf32>
    %55 = vector.broadcast %cst_16 : f32 to vector<8x128xf32>
    %56 = arith.select %53, %54, %55 : vector<8x128xi1>, vector<8x128xf32>
    %c0_17 = arith.constant 0 : index
    %c0_18 = arith.constant 0 : index
    %c0_19 = arith.constant 0 : index
    %57 = vector.load %arg5[%c0_17, %c0_18, %c0_19] : memref<1x8x128xf32, #tpu.memory_space<vmem>>, vector<1x8x128xf32>
    %58 = vector.shape_cast %57 : vector<1x8x128xf32> to vector<8x128xf32>
    %59 = vector.shape_cast %56 : vector<8x128xf32> to vector<1x8x128xf32>
    tpu.vector_store %arg5[%c0_17, %c0_18, %c0_19], %59 {strides = array<i32>} : memref<1x8x128xf32, #tpu.memory_space<vmem>>, vector<1x8x128xf32>,
    return
  }
  func.func @transform_0(%arg0: i32) -> (i32, i32) {
    %c0_i32 = arith.constant 0 : i32
    %c0_i32_0 = arith.constant 0 : i32
    %c0_i32_1 = arith.constant 0 : i32
    return %c0_i32, %c0_i32_0 : i32, i32
  }
  func.func @transform_1(%arg0: i32) -> (i32, i32) {
    %c0_i32 = arith.constant 0 : i32
    %c0_i32_0 = arith.constant 0 : i32
    %c0_i32_1 = arith.constant 0 : i32
    return %c0_i32, %c0_i32_0 : i32, i32
  }
  func.func @transform_2(%arg0: i32) -> (i32, i32, i32) {
    %c0_i32 = arith.constant 0 : i32
    %c0_i32_0 = arith.constant 0 : i32
    %c0_i32_1 = arith.constant 0 : i32
    return %arg0, %c0_i32, %c0_i32_0 : i32, i32, i32
  }
  func.func @transform_3(%arg0: i32) -> (i32, i32, i32) {
    %c0_i32 = arith.constant 0 : i32
    %c0_i32_0 = arith.constant 0 : i32
    %c0_i32_1 = arith.constant 0 : i32
    return %arg0, %c0_i32, %c0_i32_0 : i32, i32, i32
  }
  func.func @transform_4(%arg0: i32) -> (i32, i32, i32) {
    %c0_i32 = arith.constant 0 : i32
    %c0_i32_0 = arith.constant 0 : i32
    %c0_i32_1 = arith.constant 0 : i32
    return %arg0, %c0_i32, %c0_i32_0 : i32, i32, i32
  }
}

</mosaic_0001>

<bundles_post_ra>
// kernel: tpu_custom_call.1
= control target key start
LH: loop header
LB: loop body
LE: loop exit
PB: predicated region body
PF: predicated region fallthrough
CT: control target
= control target key end

     0   :  { %s3810_s0 = inlined_call_operand.hbm [shape: f32[16,16], index: 0, kind: input, shape index: {}]   ;;  %s3811_s1 = inlined_call_operand.hbm [shape: f32[16,16], index: 1, kind: input, shape index: {}]   ;;  %s3812_s2 = inlined_call_operand.hbm [shape: f32[2,16,16], index: 2, kind: input, shape index: {}]   ;;  %s3813_s3 = inlined_call_operand.hbm [shape: f32[2,16,16], index: 3, kind: input, shape index: {}]   ;;  %s3814_s4 = inlined_call_operand.hbm [shape: f32[2,8,128], index: 4, kind: output, shape index: {}]  }
   0x1   :  { %3827 = sst [smem:[#allocation16_spill]] %s3810_s0 }
   0x2   :  { %3828 = sst [smem:[#allocation17_spill]] %s3812_s2 }
   0x3   :  { %9 = vsyncpa [#allocation3], 0 }
   0x4   :  { %10 = vsyncpa [#allocation6], 0 }
   0x5   :  { %11 = vsyncpa [#allocation4], 0 }
   0x6   :  { %13 = vsyncpa [#allocation4 + $0x1], 0  ;;  %s3228_s15 = smov 0   ;;  %s3230_s16 = smov 0  }
   0x7   :  { %s3232_s17 = smov 0   ;;  %s3234_s18 = smov 0  }
   0x8 LB: > { %3829 = sst [smem:[#allocation14_spill]] %s3190_s17  ;;  %s3249_s19 = sadd.s32 4294967295, %s3194_s18   ;;  %s3194_s18 = sphi %s3234_s18, %s3862_s18   ;;  %s3190_s17 = sphi %s3232_s17, %s3859_s17   ;;  %s3186_s16 = sphi %s3230_s16, %s3861_s16   ;;  %s3182_s15 = sphi %s3228_s15, %s3860_s15  }
   0x9   : > { %s2380_s20 = sadd.s32 4294967294, %s3194_s18   ;;  %s3253_s21 = sadd.s32 1, %s3194_s18  }
   0xa   : > { %s68_s22 = sadd.s32 1, %s3190_s17  ;;  %s65_s23 = ssub.s32 %s3194_s18, %s3253_s21 }
   0xb   : > { %p75_p0 = scmp.ne.s32.totalorder %s3190_s17, %s3186_s16  ;;  %p66_p1 = scmp.eq.s32.totalorder %s65_s23, 0 }
   0xc   : > { %p76_p2 = scmp.eq.s32.totalorder %s3194_s18, 0  ;;  %p81_p3 = scmp.ne.s32.totalorder %s3186_s16, %s3182_s15 }
   0xd   : > { %p3815_p4 = scmp.eq.s32.totalorder %s3249_s19, 0  ;;  %p131_p7 = scmp.eq.s32.totalorder %s3249_s19, 1 }
   0xe   : > { %s3265_s24 = scalar_select %p66_p1, %s3190_s17, %s68_s22  }
   0xf   : > { %p3267_p5 = por %p76_p2, %p75_p0  ;;  %p3273_p6 = por %p3815_p4, %p81_p3 }
  0x10   : > { %3830 = sst [smem:[#allocation15_spill]] %s3265_s24  ;;  %p137_p8 = scmp.eq.s32.totalorder %s2380_s20, 1 }
  0x11   : > { %s3831_s25 = scalar_select %p3267_p5, 1, 0 }
  0x12   : > { %s3832_s26 = scalar_select %p3273_p6, 1, 0 }
  0x13   : > { %p2381_p9 = scmp.ge.s32.totalorder %s3194_s18, 1  ;;  %p144_p10 = scmp.lt.s32.totalorder %s3194_s18, 3 }
  0x14   : > { %p3280_p11 = por %p131_p7, %p75_p0  ;;  %p3284_p12 = por %p137_p8, %p81_p3 }
  0x15   : > { %p3288_p13 = pnand %p2381_p9, %p144_p10  ;;  %s3196_s30 = smov [#allocation2]  }
  0x16   : > { %s3833_s27 = scalar_select %p3280_p11, 1, 0 }
  0x17   : > { %s3834_s28 = scalar_select %p3284_p12, 1, 0 }
  0x18   : > { %s3835_s29 = scalar_select %p3288_p13, 1, 0 }
  0x19   : > { %p2939_p1 = pneg %p3288_p13  ;;  %s156_s5 = sshll.u32 %s3196_s30, 4  ;;  %s157_s5 = int_to_ptr.vmem [resolvable:$true] %s156_s5 }
  0x1a   : > { %s183_s7 = sand.u32 1, %s3194_s18   ;;  %s3837_s0 = sld [smem:[#allocation16_spill]] }
  0x1b   : > { %p3296_p2 = pnand %p2939_p1, %p3815_p4 }
  0x1d   : > { %p3822_p8 = pneg %p3296_p2 }
  0x20   : > { %s3004_s10 = scalar_lea.hbm %s3837_s0, 256 }
  0x21   : > { %p3005_p7 = scmp.ne.s32.totalorder %s3837_s0, %s3004_s10  ;;  %p3011_p1 = scmp.lt.u32.totalorder %s3004_s10, %s3837_s0 }
  0x23   : > { %p3007_p9 = pnand %p3822_p8, %p3005_p7 }
  0x25   : > { %p3008_p10 = pneg %p3007_p9 }
  0x27   : > { %p3013_p0 = pnand %p3011_p1, %p3008_p10 }
  0x29   : > { %3016 = shalt.err (!%p3013_p0)
}
  0x2a   : > { %s3017_s20 = scalar_lea.vmem %s157_s5, 256  ;;  %p3025_p11 = scmp.lt.s32.totalorder %s157_s5, %s157_s5 }
  0x2b   : > { %p3018_p4 = scmp.ne.s32.totalorder %s157_s5, %s3017_s20  ;;  %p3026_p6 = scmp.lt.s32.totalorder %s3017_s20, %s3017_s20 }
  0x2d   : > { %p3020_p3 = pnand %p3018_p4, %p3822_p8  ;;  %p3027_p13 = por %p3026_p6, %p3025_p11 }
  0x2f   : > { %p3021_p12 = pneg %p3020_p3 }
  0x31   : > { %p3028_p5 = pnand %p3027_p13, %p3021_p12 }
  0x33   : > { %3031 = shalt.err (!%p3028_p5)
}
  0x34   : > { %s3820_s22 = smov 128   ;;  %s3198_s23 = smov 8  }
  0x35   : > { %2942 = dma.hbm_to_vmem [thread:$0]  (!%p3296_p2), %s3837_s0, 256, %s157_s5, [#allocation3], %s3820_s22, %s3820_s22, %s3198_s23  }
  0x36   : > { %p3838_p4 = scmp.ne.s32.totalorder %s3831_s25, 0  ;;  %p3839_p6 = scmp.lt.s32.totalorder %s3194_s18, 2 }
  0x37   : > { %s185_s10 = sand.u32 1, %s3190_s17   ;;  %s3819_s12 = sshll.u32 %s3194_s18, 8 }
  0x38   : > { %p3332_p11 = pnand %p3839_p6, %p3838_p4  ;;  %s3337_s11 = sshll.u32 %s185_s10, 4 }
  0x39   : > { %s3841_s2 = sld [smem:[#allocation17_spill]]  ;;  %s187_s25 = scalar_lea.vmem [#allocation7], %s3337_s11 }
  0x3a   : > { %s3840_s9 = scalar_select %p3332_p11, 1, 0 }
  0x3b   : > { %s194_s5 = sshll.u32 %s187_s25, 4  ;;  %s3350_s30 = scalar_lea.sflag [#allocation3], %s183_s7  ;;  %s3348_s5 = int_to_ptr.vmem [resolvable:$true] %s194_s5 }
  0x3c   : > { %p3824_p12 = pneg %p3332_p11 }
  0x3f   : > { %s3345_s20 = scalar_lea.hbm %s3841_s2, %s3819_s12  ;;  %s3037_s14 = scalar_lea.hbm %s3841_s2, 512 }
  0x40   : > { %s3032_s8 = scalar_lea.hbm %s3345_s20, 256  ;;  %p3038_p3 = scmp.lt.u32.totalorder %s3345_s20, %s3841_s2 }
  0x41   : > { %p3033_p5 = scmp.ne.s32.totalorder %s3345_s20, %s3032_s8  ;;  %p3039_p7 = scmp.lt.u32.totalorder %s3037_s14, %s3032_s8 }
  0x42   : > { %p3041_p10 = scmp.lt.u32.totalorder %s3032_s8, %s3345_s20 }
  0x43   : > { %p3035_p13 = pnand %p3824_p12, %p3033_p5  ;;  %p3040_p9 = por %p3039_p7, %p3038_p3 }
  0x45   : > { %p3036_p0 = pneg %p3035_p13  ;;  %p3042_p1 = por %p3041_p10, %p3040_p9 }
  0x47   : > { %p3043_p4 = pnand %p3042_p1, %p3036_p0 }
  0x49   : > { %3046 = shalt.err (!%p3043_p4)
}
  0x4a   : > { %s3047_s7 = scalar_lea.vmem %s3348_s5, 256  ;;  %s3199_s25 = smov [#allocation7]  }
  0x4b   : > { %p3048_p6 = scmp.ne.s32.totalorder %s3348_s5, %s3047_s7  ;;  %s3052_s10 = sshll.u32 %s3199_s25, 4  ;;  %s3053_s10 = int_to_ptr.vmem [resolvable:$false] %s3052_s10 }
  0x4c   : > { %s3054_s22 = scalar_lea.vmem %s3053_s10, 512  ;;  %p3055_p8 = scmp.lt.s32.totalorder %s3348_s5, %s3053_s10 }
  0x4d   : > { %p3050_p5 = pnand %p3048_p6, %p3824_p12  ;;  %p3056_p3 = scmp.lt.s32.totalorder %s3054_s22, %s3047_s7 }
  0x4f   : > { %p3051_p13 = pneg %p3050_p5  ;;  %p3057_p7 = por %p3056_p3, %p3055_p8 }
  0x51   : > { %p3058_p9 = pnand %p3057_p7, %p3051_p13 }
  0x53   : > { %3061 = shalt.err (!%p3058_p9)
}
  0x54   : > { %s3842_s12 = smov 128   ;;  %s3200_s8 = smov [#allocation5]  }
  0x55   : > { %2949 = dma.hbm_to_vmem [thread:$0]  (!%p3332_p11), %s3345_s20, 256, %s3348_s5, %s3350_s30, %s3842_s12, %s3842_s12, %s3198_s23  }
  0x56   : > { %s169_s13 = sshll.u32 %s3200_s8, 4  ;;  %s3843_s14 = sshll.u32 %s3194_s18, 8  ;;  %s170_s13 = int_to_ptr.vmem [resolvable:$true] %s169_s13 }
  0x57   : > { %s3386_s10 = scalar_lea.hbm %s3813_s3, %s3843_s14  ;;  %s3062_s2 = scalar_lea.hbm %s3811_s1, 256 }
  0x58   : > { %p3063_p8 = scmp.ne.s32.totalorder %s3811_s1, %s3062_s2  ;;  %p3844_p0 = pneg %p3296_p2 }
  0x59   : > { %p3069_p4 = scmp.lt.u32.totalorder %s3062_s2, %s3811_s1 }
  0x5a   : > { %p3065_p10 = pnand %p3063_p8, %p3844_p0 }
  0x5c   : > { %p3066_p1 = pneg %p3065_p10 }
  0x5e   : > { %p3071_p6 = pnand %p3069_p4, %p3066_p1 }
  0x60   : > { %3074 = shalt.err (!%p3071_p6)
}
  0x61   : > { %s3075_s8 = scalar_lea.vmem %s170_s13, 256  ;;  %p3845_p13 = pmov %p3844_p0 }
  0x62   : > { %p3076_p5 = scmp.ne.s32.totalorder %s170_s13, %s3075_s8  ;;  %p3083_p9 = scmp.lt.s32.totalorder %s170_s13, %s170_s13 }
  0x63   : > { %p3084_p12 = scmp.lt.s32.totalorder %s3075_s8, %s3075_s8 }
  0x64   : > { %p3078_p3 = pnand %p3076_p5, %p3845_p13 }
  0x65   : > { %p3085_p11 = por %p3084_p12, %p3083_p9 }
  0x66   : > { %p3079_p7 = pneg %p3078_p3 }
  0x68   : > { %p3086_p0 = pnand %p3085_p11, %p3079_p7 }
  0x6a   : > { %3089 = shalt.err (!%p3086_p0)
}
  0x6b   : > { %2945 = dma.hbm_to_vmem [thread:$0]  (!%p3296_p2), %s3811_s1, 256, %s170_s13, [#allocation6], %s3842_s12, %s3842_s12, %s3198_s23  }
  0x6c   : > { %s208_s17 = scalar_lea.vmem [#allocation8], %s3337_s11  ;;  %s3090_s14 = scalar_lea.hbm %s3386_s10, 256 }
  0x6d   : > { %s215_s24 = sshll.u32 %s208_s17, 4  ;;  %p3091_p11 = scmp.ne.s32.totalorder %s3386_s10, %s3090_s14  ;;  %s3412_s24 = int_to_ptr.vmem [resolvable:$true] %s215_s24 }
  0x6e   : > { %p3846_p12 = scmp.ne.s32.totalorder %s3840_s9, 0  ;;  %s3095_s7 = scalar_lea.hbm %s3813_s3, 512 }
  0x6f   : > { %p3096_p4 = scmp.lt.u32.totalorder %s3386_s10, %s3813_s3  ;;  %p3097_p6 = scmp.lt.u32.totalorder %s3095_s7, %s3090_s14 }
  0x70   : > { %p3847_p8 = pneg %p3846_p12  ;;  %p3099_p5 = scmp.lt.u32.totalorder %s3090_s14, %s3386_s10 }
  0x71   : > { %p3098_p2 = por %p3097_p6, %p3096_p4 }
  0x72   : > { %p3093_p10 = pnand %p3091_p11, %p3847_p8 }
  0x73   : > { %p3100_p13 = por %p3099_p5, %p3098_p2 }
  0x74   : > { %p3094_p1 = pneg %p3093_p10 }
  0x76   : > { %p3101_p3 = pnand %p3100_p13, %p3094_p1 }
  0x78   : > { %3104 = shalt.err (!%p3101_p3)
}
  0x79   : > { %s3105_s11 = scalar_lea.vmem %s3412_s24, 256  ;;  %p3848_p9 = pmov %p3847_p8 }
  0x7a   : > { %p3106_p7 = scmp.ne.s32.totalorder %s3412_s24, %s3105_s11  ;;  %s3201_s13 = smov [#allocation8]  }
  0x7b   : > { %s3110_s5 = sshll.u32 %s3201_s13, 4  ;;  %s3111_s5 = int_to_ptr.vmem [resolvable:$false] %s3110_s5 }
  0x7c   : > { %p3108_p0 = pnand %p3106_p7, %p3848_p9  ;;  %s3112_s8 = scalar_lea.vmem %s3111_s5, 512 }
  0x7d   : > { %p3113_p8 = scmp.lt.s32.totalorder %s3412_s24, %s3111_s5  ;;  %p3114_p10 = scmp.lt.s32.totalorder %s3112_s8, %s3105_s11 }
  0x7e   : > { %p3109_p11 = pneg %p3108_p0 }
  0x7f   : > { %p3115_p4 = por %p3114_p10, %p3113_p8 }
  0x81   : > { %p3116_p6 = pnand %p3115_p4, %p3109_p11 }
  0x83   : > { %3119 = shalt.err (!%p3116_p6)
}
  0x84   : > { %2952 = dma.hbm_to_vmem [thread:$0]  (!%p3846_p12), %s3386_s10, 256, %s3412_s24, %s3350_s30, %s3842_s12, %s3842_s12, %s3198_s23  }
  0x85   : > { %p3849_p1 = scmp.ne.s32.totalorder %s3835_s29, 0 }
  0x86   : > { %p3850_p2 = scmp.eq.s32.totalorder (!%p3849_p1), %s3249_s19, 0 }
  0x87   : > { %227 = sbr.rel (%p3849_p1) target bundleno = 1190 (0x4a6), region = 36 }
  0x8e   : > { %3165 = dma.done.wait (%p3850_p2), [#allocation3], 256   ;;  %p3851_p5 = pmov %p3850_p2 }
  0x8f   : > { %p3852_p13 = pmov %p3850_p2 }
  0x90   : > { %3167 = vsyncadd (%p3851_p5), [#allocation3], 4294967040 }
  0x91   : > { %3169 = dma.done.wait (%p3852_p13), [#allocation6], 256   ;;  %p3853_p3 = pmov %p3850_p2 }
  0x92   : > { %s237_s9 = sand.u32 1, %s3249_s19   ;;  %s3453_s23 = sand.u32 1, %s3186_s16  }
  0x93   : > { %3171 = vsyncadd (%p3853_p3), [#allocation6], 4294967040  ;;  %s2394_s29 = sshll.u32 %s3453_s23, 4  ;;  %s238_s30 = scalar_lea.sflag [#allocation3], %s237_s9 }
  0x94   : > { %s241_s12 = scalar_lea.vmem [#allocation7], %s2394_s29  ;;  %p3854_p12 = scmp.ne.s32.totalorder %s3832_s26, 0 }
  0x96   : > { %3173 = dma.done.wait (%p3854_p12), %s238_s30, 512  }
  0x97   : > { %3175 = vsyncadd (%p3854_p12), %s238_s30, 4294966784  ;;  %vm294_vm0 = vcmask 130048   ;;  %v282_v0 = vld [vmem:[#allocation5] sm:$0xff]  ;;  %v283_v1 = vld [vmem:[#allocation5 + $0x8] sm:$0xff]  ;;  %s250_s10 = scalar_lea.vmem [#allocation8], %s2394_s29  ;;  %s2396_s26 = sshll.u32 %s3453_s23, 3 }
  0x98   : > { %v284_v2 = vld [vmem:[%s241_s12] sm:$0xff]  ;;  %v326_v3 = vand.u32 4294901760, %v282_v0  ;;  %v329_v4 = vand.u32 4294901760, %v283_v1  ;;  %v285_v8 = vld [vmem:[%s241_s12 + $0x8] sm:$0xff]  ;;  %s2398_s0 = sshll.u32 %s3249_s19, 7  ;;  %s279_s2 = scalar_lea.vmem [#allocation9], %s2396_s26 }
  0x99   : > { %v286_v5 = vld [vmem:[%s250_s10] sm:$0xff]  ;;  %v288_v6 = vmul.f32 %v284_v2, %v284_v2  ;;  %v296_v7 = vsel %vm294_vm0, %v284_v2, 0  ;;  %v287_v9 = vld [vmem:[%s250_s10 + $0x8] sm:$0xff]  ;;  %v299_v12 = vsel %vm294_vm0, %v285_v8, 0  ;;  %v289_v29 = vmul.f32 %v285_v8, %v285_v8  ;;  %s2271_s17 = sshll.u32 %s279_s2, 4  ;;  %s3766_s25 = scalar_lea.hbm %s3814_s4, %s2398_s0  ;;  %s3768_s17 = int_to_ptr.vmem [resolvable:$true] %s2271_s17 }
  0x9a   : > { %v292_v10 = vmul.f32 %v286_v5, %v284_v2  ;;  %v3461_v11 = vand.u32 4294901760, %v296_v7  ;;  %v302_v13 = vsel %vm294_vm0, %v286_v5, 0  ;;  %v3465_v14 = vpack.c.bf16 %v329_v4, %v326_v3  ;;  %s2258_s7 = scalar_lea.sflag [#allocation4], %s3453_s23  ;;  %s3120_s22 = scalar_lea.vmem %s3768_s17, 128 }
  0x9b   : > { %v3467_v15 = vand.u32 4294901760, %v299_v12  ;;  %v3469_v16 = vsub.f32 %v282_v0, %v326_v3  ;;  %v3471_v17 = vsub.f32 %v283_v1, %v329_v4  ;;  %v3476_v19 = vand.u32 4294901760, %v302_v13  ;;  %p3121_p7 = scmp.ne.s32.totalorder %s3768_s17, %s3120_s22  ;;  %p3855_p9 = scmp.ne.s32.totalorder %s3833_s27, 0 }
  0x9c   : > { %v3474_v18 = vsub.f32 %v296_v7, %v3461_v11  ;;  %v305_v20 = vsel %vm294_vm0, %v287_v9, 0  ;;  %v308_v21 = vsel %vm294_vm0, %v288_v6, 0  ;;  %2776 = vmatprep.subr.bf16.mxu0 %v3465_v14  ;;  %v311_v37 = vsel %vm294_vm0, %v289_v29, 0  ;;  %s3202_s19 = smov [#allocation9]  }
  0x9d   : > { %v3482_v22 = vsub.f32 %v299_v12, %v3467_v15  ;;  %v495_v23 = vand.u32 4294901760, %v3469_v16  ;;  %v502_v24 = vand.u32 4294901760, %v3471_v17  ;;  %v3486_v25 = vand.u32 4294901760, %v305_v20  ;;  %2778 = vmatpush3.bf16.msra.mxu0 %v3465_v14  ;;  %p3122_p0 = pnand %p3121_p7, %p3855_p9  ;;  %s3124_s20 = sshll.u32 %s3202_s19, 4  ;;  %s3125_s20 = int_to_ptr.vmem [resolvable:$false] %s3124_s20 }
  0x9e   : > { %v394_v26 = vand.u32 4294901760, %v3474_v18  ;;  %v3491_v27 = vsub.f32 %v302_v13, %v3476_v19  ;;  %v3493_v28 = vand.u32 4294901760, %v308_v21  ;;  %v3521_v45 = vand.u32 4294901760, %v311_v37  ;;  %s3126_s11 = scalar_lea.vmem %s3125_s20, 256  ;;  %p3127_p8 = scmp.lt.s32.totalorder %s3768_s17, %s3125_s20 }
  0x9f   : > { %v404_v30 = vand.u32 4294901760, %v3482_v22  ;;  %v496_v31 = vsub.f32 %v3469_v16, %v495_v23  ;;  %v503_v32 = vsub.f32 %v3471_v17, %v502_v24  ;;  %v3503_v33 = vsub.f32 %v305_v20, %v3486_v25  ;;  %p3123_p11 = pneg %p3122_p0  ;;  %p3128_p10 = scmp.lt.s32.totalorder %s3126_s11, %s3120_s22 }
  0xa0   : > { %v395_v34 = vsub.f32 %v3474_v18, %v394_v26  ;;  %v414_v35 = vand.u32 4294901760, %v3491_v27  ;;  %v3510_v36 = vsub.f32 %v308_v21, %v3493_v28  ;;  %v290_v49 = vmul.f32 %v286_v5, %v286_v5 }
  0xa1   : > { %v405_v38 = vsub.f32 %v3482_v22, %v404_v30  ;;  %v497_v39 = vand.u32 4294901760, %v496_v31  ;;  %v504_v40 = vand.u32 4294901760, %v503_v32  ;;  %v424_v41 = vand.u32 4294901760, %v3503_v33  ;;  %p3129_p4 = por %p3128_p10, %p3127_p8 }
  0xa2   : > { %v396_v42 = vand.u32 4294901760, %v395_v34  ;;  %v415_v43 = vsub.f32 %v3491_v27, %v414_v35  ;;  %v434_v44 = vand.u32 4294901760, %v3510_v36  ;;  %v3530_v52 = vsub.f32 %v311_v37, %v3521_v45 }
  0xa3   : > { %v406_v46 = vand.u32 4294901760, %v405_v38  ;;  %v2779_v47 = vpack.c.bf16 %v504_v40, %v497_v39  ;;  %v425_v48 = vsub.f32 %v3503_v33, %v424_v41  ;;  %v291_v53 = vmul.f32 %v287_v9, %v287_v9  ;;  %p3130_p6 = pnand %p3129_p4, %p3123_p11 }
  0xa4   : > { %2551 = vmatprep.mubr.f32.mxu0 %v396_v42  ;;  %v416_v50 = vand.u32 4294901760, %v415_v43  ;;  %v435_v51 = vsub.f32 %v3510_v36, %v434_v44  ;;  %v314_v55 = vsel %vm294_vm0, %v290_v49, 0  ;;  %v320_v56 = vsel %vm294_vm0, %v292_v10, 0 }
  0xa5   : > { %2552 = vmatmul.mubr.f32.vlgmr.msra.gmra.mrb[0].mxu0 %v406_v46  ;;  %2780 = vmatprep.subr.bf16.mxu0 %v2779_v47  ;;  %v426_v54 = vand.u32 4294901760, %v425_v48  ;;  %v293_v57 = vmul.f32 %v287_v9, %v285_v8  ;;  %v444_v59 = vand.u32 4294901760, %v3530_v52  ;;  %v3535_v60 = vand.u32 4294901760, %v314_v55 }
  0xa6   : > { %2782 = vmatpush3.bf16.msra.mxu0 %v2779_v47  ;;  %2554 = vmatprep.mubr.f32.mxu0 %v416_v50  ;;  %v436_v58 = vand.u32 4294901760, %v435_v51  ;;  %v317_v61 = vsel %vm294_vm0, %v291_v53, 0  ;;  %v3540_v63 = vand.u32 4294901760, %v320_v56  ;;  %v2783_v1 = vpack.c.bf16 %v3471_v17, %v3469_v16 }
  0xa7   : > { %v3538_v62 = vand.u32 4294901760, %v317_v61  ;;  %v323_v0 = vsel %vm294_vm0, %v293_v57, 0  ;;  %v445_v2 = vsub.f32 %v3530_v52, %v444_v59  ;;  %v453_v3 = vsub.f32 %v314_v55, %v3535_v60 }
  0xa8   : > { %v3549_v4 = vand.u32 4294901760, %v323_v0  ;;  %v473_v6 = vsub.f32 %v320_v56, %v3540_v63  ;;  %2784 = vmatprep.subr.bf16.mxu0 %v2783_v1  ;;  %v2791_v39 = vpack.c.bf16 %v502_v24, %v495_v23 }
  0xa9   : > { %2555 = vmatmul.mubr.f32.gmra.mrb[2].mxu0 %v426_v54  ;;  %v463_v5 = vsub.f32 %v317_v61, %v3538_v62  ;;  %v446_v7 = vand.u32 4294901760, %v445_v2  ;;  %v454_v8 = vand.u32 4294901760, %v453_v3 }
  0xaa   : > { %2557 = vmatprep.mubr.f32.mxu0 %v436_v58  ;;  %v483_v9 = vsub.f32 %v323_v0, %v3549_v4  ;;  %v474_v12 = vand.u32 4294901760, %v473_v6 }
  0xab   : > { %v464_v10 = vand.u32 4294901760, %v463_v5  ;;  %v455_v13 = vsub.f32 %v453_v3, %v454_v8 }
  0xac   : > { %v484_v20 = vand.u32 4294901760, %v483_v9  ;;  %v475_v29 = vsub.f32 %v473_v6, %v474_v12 }
  0xad   : > { %2558 = vmatmul.mubr.f32.gmra.mrb[4].mxu0 %v446_v7  ;;  %v465_v21 = vsub.f32 %v463_v5, %v464_v10  ;;  %v456_v31 = vand.u32 4294901760, %v455_v13 }
  0xae   : > { %v485_v32 = vsub.f32 %v483_v9, %v484_v20  ;;  %v476_v37 = vand.u32 4294901760, %v475_v29 }
  0xaf   : > { %v466_v34 = vand.u32 4294901760, %v465_v21  ;;  %2560 = vmatprep.mubr.f32.mxu0 %v456_v31 }
  0xb0   : > { %v486_v38 = vand.u32 4294901760, %v485_v32 }
  0xb1   : > { %2561 = vmatmul.mubr.f32.gmra.mrb[6].mxu0 %v466_v34 }
  0xb2   : > { %2563 = vmatprep.mubr.f32.mxu0 %v476_v37 }
  0xb5   : > { %2564 = vmatmul.mubr.f32.gmra.mrb[8].mxu0 %v486_v38 }
  0xb6   : > { %2570 = vmatprep.mubr.f32.mxu0 %v3461_v11 }
  0xb9   : > { %2571 = vmatmul.mubr.f32.vlgmr.msra.gmra.mrb[0].mxu0 %v3467_v15 }
  0xba   : > { %2786 = vmatpush3.bf16.msra.mxu0 %v2783_v1  ;;  %2573 = vmatprep.mubr.f32.mxu0 %v3476_v19 }
  0xbb   : > { %2788 = vmatprep.subr.bf16.mxu0 %v3465_v14 }
  0xbd   : > { %2574 = vmatmul.mubr.f32.gmra.mrb[2].mxu0 %v3486_v25 }
  0xbe   : > { %2576 = vmatprep.mubr.f32.mxu0 %v3493_v28 }
  0xc1   : > { %2577 = vmatmul.mubr.f32.gmra.mrb[4].mxu0 %v3521_v45 }
  0xc2   : > { %2579 = vmatprep.mubr.f32.mxu0 %v3535_v60 }
  0xc5   : > { %2580 = vmatmul.mubr.f32.gmra.mrb[6].mxu0 %v3538_v62 }
  0xc6   : > { %2582 = vmatprep.mubr.f32.mxu0 %v3540_v63 }
  0xc9   : > { %2583 = vmatmul.mubr.f32.gmra.mrb[8].mxu0 %v3549_v4 }
  0xca   : > { %2589 = vmatprep.mubr.f32.mxu0 %v3474_v18 }
  0xcd   : > { %2590 = vmatmul.mubr.f32.vlgmr.msra.gmra.mrb[0].mxu0 %v3482_v22  ;;  %v281_v22 = vld [vmem:[#allocation2 + $0x8] sm:$0xff] }
  0xce   : > { %2790 = vmatpush3.bf16.msra.mxu0 %v3465_v14  ;;  %2592 = vmatprep.mubr.f32.mxu0 %v3491_v27  ;;  %v1365_v24 = vand.u32 4294901760, %v281_v22 }
  0xcf   : > { %2792 = vmatprep.subr.bf16.mxu0 %v2791_v39 }
  0xd1   : > { %2593 = vmatmul.mubr.f32.gmra.mrb[2].mxu0 %v3503_v33 }
  0xd2   : > { %2595 = vmatprep.mubr.f32.mxu0 %v3510_v36 }
  0xd5   : > { %2596 = vmatmul.mubr.f32.gmra.mrb[4].mxu0 %v3530_v52 }
  0xd6   : > { %2598 = vmatprep.mubr.f32.mxu0 %v453_v3 }
  0xd9   : > { %2599 = vmatmul.mubr.f32.gmra.mrb[6].mxu0 %v463_v5 }
  0xda   : > { %2601 = vmatprep.mubr.f32.mxu0 %v473_v6 }
  0xdd   : > { %2602 = vmatmul.mubr.f32.gmra.mrb[8].mxu0 %v483_v9 }
  0xde   : > { %2608 = vmatprep.mubr.f32.mxu0 %v394_v26 }
  0xe1   : > { %2609 = vmatmul.mubr.f32.vlgmr.msra.gmra.mrb[0].mxu0 %v404_v30 }
  0xe2   : > { %2794 = vmatpush3.bf16.msra.mxu0 %v2791_v39  ;;  %2611 = vmatprep.mubr.f32.mxu0 %v414_v35  ;;  %v1537_v35 = vsub.f32 %v281_v22, %v1365_v24 }
  0xe3   : > { %2796 = vmatprep.subr.bf16.mxu0 %v3465_v14 }
  0xe4   : > { %v1538_v40 = vand.u32 4294901760, %v1537_v35 }
  0xe5   : > { %2612 = vmatmul.mubr.f32.gmra.mrb[2].mxu0 %v424_v41 }
  0xe6   : > { %2614 = vmatprep.mubr.f32.mxu0 %v434_v44  ;;  %v1539_v42 = vsub.f32 %v1537_v35, %v1538_v40 }
  0xe8   : > { %v1540_v44 = vand.u32 4294901760, %v1539_v42 }
  0xe9   : > { %2615 = vmatmul.mubr.f32.gmra.mrb[4].mxu0 %v444_v59 }
  0xea   : > { %2617 = vmatprep.mubr.f32.mxu0 %v454_v8 }
  0xed   : > { %2618 = vmatmul.mubr.f32.gmra.mrb[6].mxu0 %v464_v10 }
  0xee   : > { %2620 = vmatprep.mubr.f32.mxu0 %v474_v12 }
  0xf1   : > { %2621 = vmatmul.mubr.f32.gmra.mrb[8].mxu0 %v484_v20 }
  0xf2   : > { %2627 = vmatprep.mubr.f32.mxu0 %v3461_v11 }
  0xf5   : > { %2628 = vmatmul.mubr.f32.vlgmr.msra.gmra.mrb[0].mxu0 %v3467_v15 }
  0xf6   : > { %2798 = vmatpush3.bf16.msra.mxu0 %v3465_v14  ;;  %2630 = vmatprep.mubr.f32.mxu0 %v3476_v19 }
  0xf9   : > { %2631 = vmatmul.mubr.f32.gmra.mrb[2].mxu0 %v3486_v25 }
  0xfa   : > { %2633 = vmatprep.mubr.f32.mxu0 %v3493_v28 }
  0xfd   : > { %2634 = vmatmul.mubr.f32.gmra.mrb[4].mxu0 %v3521_v45 }
  0xfe   : > { %2636 = vmatprep.mubr.f32.mxu0 %v3535_v60 }
 0x101   : > { %2637 = vmatmul.mubr.f32.gmra.mrb[6].mxu0 %v3538_v62 }
 0x102   : > { %2639 = vmatprep.mubr.f32.mxu0 %v3540_v63 }
 0x105   : > { %2640 = vmatmul.mubr.f32.gmra.mrb[8].mxu0 %v3549_v4 }
 0x106   : > { %2646 = vmatprep.mubr.f32.mxu0 %v3461_v11 }
 0x109   : > { %2647 = vmatmul.mubr.f32.vlgmr.msra.gmra.mrb[0].mxu0 %v3467_v15 }
 0x10a   : > { %2649 = vmatprep.mubr.f32.mxu0 %v3476_v19  ;;  %v280_v19 = vld [vmem:[#allocation2] sm:$0xff] }
 0x10b   : > { %v1362_v23 = vand.u32 4294901760, %v280_v19 }
 0x10d   : > { %2650 = vmatmul.mubr.f32.gmra.mrb[2].mxu0 %v3486_v25  ;;  %v3610_v27 = vpack.c.bf16 %v1365_v24, %v1362_v23  ;;  %v1530_v33 = vsub.f32 %v280_v19, %v1362_v23 }
 0x10e   : > { %2652 = vmatprep.mubr.f32.mxu0 %v3493_v28 }
 0x10f   : > { %2800 = vmatprep.subr.bf16.mxu1 %v3610_v27  ;;  %v1531_v36 = vand.u32 4294901760, %v1530_v33  ;;  %v3614_v46 = vpack.c.bf16 %v1537_v35, %v1530_v33 }
 0x110   : > { %2802 = vmatpush3.bf16.msra.mxu1 %v3610_v27 }
 0x111   : > { %2653 = vmatmul.mubr.f32.gmra.mrb[4].mxu0 %v3521_v45  ;;  %v1532_v41 = vsub.f32 %v1530_v33, %v1531_v36  ;;  %v3616_v47 = vpack.c.bf16 %v1538_v40, %v1531_v36 }
 0x112   : > { %2655 = vmatprep.mubr.f32.mxu0 %v3535_v60 }
 0x113   : > { %v1533_v43 = vand.u32 4294901760, %v1532_v41 }
 0x115   : > { %2656 = vmatmul.mubr.f32.gmra.mrb[6].mxu0 %v3538_v62  ;;  %v2803_v45 = vpack.c.bf16 %v1540_v44, %v1533_v43 }
 0x116   : > { %2658 = vmatprep.mubr.f32.mxu0 %v3540_v63 }
 0x117   : > { %2804 = vmatprep.subr.bf16.mxu1 %v2803_v45 }
 0x119   : > { %2659 = vmatmul.mubr.f32.gmra.mrb[8].mxu0 %v3549_v4 }
 0x1dc   : > { %v2648_v14 = vpop.f32.mrb[0].mxu0 }
 0x1dd   : > { %v1113_v11 = vpop.f32.mrb[1].mxu0 }
 0x1de   : > { %1171 = vxpose.xlu0.b32.start [1/2] (short) (narrow) %v1113_v11, 16 }
 0x1e0   : > { %v2651_v15 = vpop.f32.mrb[2].mxu0 }
 0x1e1   : > { %v1125_v16 = vpop.f32.mrb[3].mxu0 }
 0x1e2   : > { %1172 = vxpose.xlu0.b32.end [2/2] (short) (narrow) %v2648_v14, 16  ;;  %1203 = vxpose.xlu1.b32.start [1/2] (short) (narrow) %v1125_v16, 16 }
 0x1e4   : > { %v2654_v17 = vpop.f32.mrb[4].mxu0 }
 0x1e5   : > { %v1137_v18 = vpop.f32.mrb[5].mxu0 }
 0x1e6   : > { %1204 = vxpose.xlu1.b32.end [2/2] (short) (narrow) %v2651_v15, 16  ;;  %1235 = vxpose.xlu0.b32.start [1/2] (short) (narrow) %v1137_v18, 16 }
 0x1e8   : > { %v2657_v25 = vpop.f32.mrb[6].mxu0 }
 0x1e9   : > { %v1149_v26 = vpop.f32.mrb[7].mxu0 }
 0x1ea   : > { %1236 = vxpose.xlu0.b32.end [2/2] (short) (narrow) %v2654_v17, 16  ;;  %1267 = vxpose.xlu1.b32.start [1/2] (short) (narrow) %v1149_v26, 16 }
 0x1ec   : > { %v2660_v28 = vpop.f32.mrb[8].mxu0 }
 0x1ed   : > { %v1161_v30 = vpop.f32.mrb[9].mxu0 }
 0x1ee   : > { %1268 = vxpose.xlu1.b32.end [2/2] (short) (narrow) %v2657_v25, 16  ;;  %1299 = vxpose.xlu0.b32.start [1/2] (short) (narrow) %v1161_v30, 16 }
 0x1f2   : > { %1300 = vxpose.xlu0.b32.end [2/2] (short) (narrow) %v2660_v28, 16 }
 0x25e   : > { %v1187_v48 = vpop.trf.xlu0 }
 0x25f   : > { %v1332_v49 = vsel %vm294_vm0, %v1187_v48, 0 }
 0x260   : > { %v3619_v50 = vand.u32 4294901760, %v1332_v49 }
 0x262   : > { %v3622_v51 = vsub.f32 %v1332_v49, %v3619_v50  ;;  %v1188_v52 = vpop.trf.xlu0  ;;  %v1219_v53 = vpop.trf.xlu1 }
 0x263   : > { %v1335_v54 = vsel %vm294_vm0, %v1188_v52, 0  ;;  %v1338_v55 = vsel %vm294_vm0, %v1219_v53, 0 }
 0x264   : > { %v3626_v56 = vand.u32 4294901760, %v1335_v54  ;;  %v3628_v57 = vand.u32 4294901760, %v1338_v55  ;;  %v1430_v58 = vand.u32 4294901760, %v3622_v51 }
 0x266   : > { %v3632_v59 = vsub.f32 %v1335_v54, %v3626_v56  ;;  %v3635_v60 = vsub.f32 %v1338_v55, %v3628_v57  ;;  %v1220_v61 = vpop.trf.xlu1  ;;  %v1251_v62 = vpop.trf.xlu0  ;;  %v1431_v63 = vsub.f32 %v3622_v51, %v1430_v58 }
 0x267   : > { %v1341_v0 = vsel %vm294_vm0, %v1220_v61, 0  ;;  %v1344_v1 = vsel %vm294_vm0, %v1251_v62, 0 }
 0x268   : > { %v1440_v2 = vand.u32 4294901760, %v3632_v59  ;;  %v1450_v3 = vand.u32 4294901760, %v3635_v60  ;;  %v3644_v4 = vand.u32 4294901760, %v1341_v0  ;;  %v3646_v5 = vand.u32 4294901760, %v1344_v1 }
 0x269   : > { %v1432_v6 = vand.u32 4294901760, %v1431_v63 }
 0x26a   : > { %v3649_v7 = vsub.f32 %v1341_v0, %v3644_v4  ;;  %v3652_v8 = vsub.f32 %v1344_v1, %v3646_v5  ;;  %v1252_v9 = vpop.trf.xlu0  ;;  %v1283_v10 = vpop.trf.xlu1  ;;  %v1441_v12 = vsub.f32 %v3632_v59, %v1440_v2  ;;  %v1451_v13 = vsub.f32 %v3635_v60, %v1450_v3 }
 0x26b   : > { %2665 = vmatprep.mubr.f32.mxu1 %v1432_v6  ;;  %v1347_v20 = vsel %vm294_vm0, %v1252_v9, 0  ;;  %v1350_v21 = vsel %vm294_vm0, %v1283_v10, 0 }
 0x26c   : > { %v1460_v29 = vand.u32 4294901760, %v3649_v7  ;;  %v1470_v31 = vand.u32 4294901760, %v3652_v8  ;;  %v3664_v32 = vand.u32 4294901760, %v1347_v20  ;;  %v3666_v34 = vand.u32 4294901760, %v1350_v21 }
 0x26d   : > { %v1442_v37 = vand.u32 4294901760, %v1441_v12  ;;  %v1452_v38 = vand.u32 4294901760, %v1451_v13 }
 0x26e   : > { %v3669_v39 = vsub.f32 %v1347_v20, %v3664_v32  ;;  %v3672_v14 = vsub.f32 %v1350_v21, %v3666_v34  ;;  %v1284_v11 = vpop.trf.xlu1  ;;  %v1315_v15 = vpop.trf.xlu0  ;;  %v1461_v16 = vsub.f32 %v3649_v7, %v1460_v29  ;;  %v1471_v17 = vsub.f32 %v3652_v8, %v1470_v31 }
 0x26f   : > { %v1353_v18 = vsel %vm294_vm0, %v1284_v11, 0  ;;  %v1356_v19 = vsel %vm294_vm0, %v1315_v15, 0  ;;  %2666 = vmatmul.mubr.f32.vlgmr.msra.gmra.mrb[0].mxu1 %v1442_v37 }
 0x270   : > { %v1480_v22 = vand.u32 4294901760, %v3669_v39  ;;  %v1490_v23 = vand.u32 4294901760, %v3672_v14  ;;  %v3684_v24 = vand.u32 4294901760, %v1353_v18  ;;  %v3686_v25 = vand.u32 4294901760, %v1356_v19  ;;  %2668 = vmatprep.mubr.f32.mxu1 %v1452_v38  ;;  %2806 = vmatpush3.bf16.msra.mxu1 %v2803_v45 }
 0x271   : > { %v1462_v26 = vand.u32 4294901760, %v1461_v16  ;;  %v1472_v28 = vand.u32 4294901760, %v1471_v17  ;;  %2808 = vmatprep.subr.bf16.mxu1 %v3614_v46 }
 0x272   : > { %v1499_v30 = vsub.f32 %v1353_v18, %v3684_v24  ;;  %v1509_v33 = vsub.f32 %v1356_v19, %v3686_v25  ;;  %v1316_v35 = vpop.trf.xlu0  ;;  %v1481_v36 = vsub.f32 %v3669_v39, %v1480_v22  ;;  %v1491_v40 = vsub.f32 %v3672_v14, %v1490_v23 }
 0x273   : > { %v1359_v41 = vsel %vm294_vm0, %v1316_v35, 0  ;;  %2669 = vmatmul.mubr.f32.gmra.mrb[2].mxu1 %v1462_v26 }
 0x274   : > { %v1500_v42 = vand.u32 4294901760, %v1499_v30  ;;  %v1510_v43 = vand.u32 4294901760, %v1509_v33  ;;  %v3698_v44 = vand.u32 4294901760, %v1359_v41  ;;  %2671 = vmatprep.mubr.f32.mxu1 %v1472_v28  ;;  %v1482_v45 = vand.u32 4294901760, %v1481_v36 }
 0x275   : > { %v1492_v48 = vand.u32 4294901760, %v1491_v40  ;;  %v2247_v36 = vlaneseq }
 0x276   : > { %v1519_v49 = vsub.f32 %v1359_v41, %v3698_v44  ;;  %v1501_v52 = vsub.f32 %v1499_v30, %v1500_v42  ;;  %v1511_v53 = vsub.f32 %v1509_v33, %v1510_v43 }
 0x277   : > { %2672 = vmatmul.mubr.f32.gmra.mrb[4].mxu1 %v1482_v45  ;;  %v2248_v40 = vshrl.u32 %v2247_v36, 7  ;;  %v2250_v41 = vand.u32 127, %v2247_v36 }
 0x278   : > { %v1520_v54 = vand.u32 4294901760, %v1519_v49  ;;  %2674 = vmatprep.mubr.f32.mxu1 %v1492_v48  ;;  %v1502_v55 = vand.u32 4294901760, %v1501_v52  ;;  %v1512_v61 = vand.u32 4294901760, %v1511_v53 }
 0x279   : > { %vm2251_vm1 = vcmp.eq.s32.totalorder %v2248_v40, 0  ;;  %vm2252_vm2 = vcmp.eq.s32.totalorder %v2250_v41, 0 }
 0x27a   : > { %v1521_v62 = vsub.f32 %v1519_v49, %v1520_v54  ;;  %vm2253_vm3 = vmand %vm2251_vm1, %vm2252_vm2 }
 0x27b   : > { %2675 = vmatmul.mubr.f32.gmra.mrb[6].mxu1 %v1502_v55 }
 0x27c   : > { %2677 = vmatprep.mubr.f32.mxu1 %v1512_v61  ;;  %v1522_v63 = vand.u32 4294901760, %v1521_v62 }
 0x27f   : > { %2678 = vmatmul.mubr.f32.gmra.mrb[8].mxu1 %v1522_v63 }
 0x280   : > { %2684 = vmatprep.mubr.f32.mxu1 %v3619_v50 }
 0x283   : > { %2685 = vmatmul.mubr.f32.vlgmr.msra.gmra.mrb[0].mxu1 %v3626_v56 }
 0x284   : > { %2687 = vmatprep.mubr.f32.mxu1 %v3628_v57  ;;  %2810 = vmatpush3.bf16.msra.mxu1 %v3614_v46 }
 0x285   : > { %2812 = vmatprep.subr.bf16.mxu1 %v3610_v27 }
 0x287   : > { %2688 = vmatmul.mubr.f32.gmra.mrb[2].mxu1 %v3644_v4 }
 0x288   : > { %2690 = vmatprep.mubr.f32.mxu1 %v3646_v5 }
 0x28b   : > { %2691 = vmatmul.mubr.f32.gmra.mrb[4].mxu1 %v3664_v32 }
 0x28c   : > { %2693 = vmatprep.mubr.f32.mxu1 %v3666_v34 }
 0x28f   : > { %2694 = vmatmul.mubr.f32.gmra.mrb[6].mxu1 %v3684_v24 }
 0x290   : > { %2696 = vmatprep.mubr.f32.mxu1 %v3686_v25 }
 0x293   : > { %2697 = vmatmul.mubr.f32.gmra.mrb[8].mxu1 %v3698_v44 }
 0x294   : > { %2703 = vmatprep.mubr.f32.mxu1 %v3622_v51 }
 0x297   : > { %2704 = vmatmul.mubr.f32.vlgmr.msra.gmra.mrb[0].mxu1 %v3632_v59 }
 0x298   : > { %2706 = vmatprep.mubr.f32.mxu1 %v3635_v60  ;;  %2814 = vmatpush3.bf16.msra.mxu1 %v3610_v27 }
 0x299   : > { %2816 = vmatprep.subr.bf16.mxu1 %v3616_v47 }
 0x29b   : > { %2707 = vmatmul.mubr.f32.gmra.mrb[2].mxu1 %v3649_v7 }
 0x29c   : > { %2709 = vmatprep.mubr.f32.mxu1 %v3652_v8 }
 0x29f   : > { %2710 = vmatmul.mubr.f32.gmra.mrb[4].mxu1 %v3669_v39 }
 0x2a0   : > { %2712 = vmatprep.mubr.f32.mxu1 %v3672_v14 }
 0x2a3   : > { %2713 = vmatmul.mubr.f32.gmra.mrb[6].mxu1 %v1499_v30 }
 0x2a4   : > { %2715 = vmatprep.mubr.f32.mxu1 %v1509_v33 }
 0x2a7   : > { %2716 = vmatmul.mubr.f32.gmra.mrb[8].mxu1 %v1519_v49 }
 0x2a8   : > { %2722 = vmatprep.mubr.f32.mxu1 %v1430_v58 }
 0x2ab   : > { %2723 = vmatmul.mubr.f32.vlgmr.msra.gmra.mrb[0].mxu1 %v1440_v2 }
 0x2ac   : > { %2725 = vmatprep.mubr.f32.mxu1 %v1450_v3  ;;  %2818 = vmatpush3.bf16.msra.mxu1 %v3616_v47 }
 0x2ad   : > { %2820 = vmatprep.subr.bf16.mxu1 %v3610_v27 }
 0x2af   : > { %2726 = vmatmul.mubr.f32.gmra.mrb[2].mxu1 %v1460_v29 }
 0x2b0   : > { %2728 = vmatprep.mubr.f32.mxu1 %v1470_v31 }
 0x2b3   : > { %2729 = vmatmul.mubr.f32.gmra.mrb[4].mxu1 %v1480_v22 }
 0x2b4   : > { %2731 = vmatprep.mubr.f32.mxu1 %v1490_v23 }
 0x2b7   : > { %2732 = vmatmul.mubr.f32.gmra.mrb[6].mxu1 %v1500_v42 }
 0x2b8   : > { %2734 = vmatprep.mubr.f32.mxu1 %v1510_v43 }
 0x2bb   : > { %2735 = vmatmul.mubr.f32.gmra.mrb[8].mxu1 %v1520_v54 }
 0x2bc   : > { %2741 = vmatprep.mubr.f32.mxu1 %v3619_v50 }
 0x2bf   : > { %2742 = vmatmul.mubr.f32.vlgmr.msra.gmra.mrb[0].mxu1 %v3626_v56 }
 0x2c0   : > { %2744 = vmatprep.mubr.f32.mxu1 %v3628_v57  ;;  %2822 = vmatpush3.bf16.msra.mxu1 %v3610_v27 }
 0x2c3   : > { %2745 = vmatmul.mubr.f32.gmra.mrb[2].mxu1 %v3644_v4 }
 0x2c4   : > { %2747 = vmatprep.mubr.f32.mxu1 %v3646_v5 }
 0x2c7   : > { %2748 = vmatmul.mubr.f32.gmra.mrb[4].mxu1 %v3664_v32 }
 0x2c8   : > { %2750 = vmatprep.mubr.f32.mxu1 %v3666_v34 }
 0x2cb   : > { %2751 = vmatmul.mubr.f32.gmra.mrb[6].mxu1 %v3684_v24 }
 0x2cc   : > { %2753 = vmatprep.mubr.f32.mxu1 %v3686_v25 }
 0x2cf   : > { %2754 = vmatmul.mubr.f32.gmra.mrb[8].mxu1 %v3698_v44 }
 0x2d0   : > { %2760 = vmatprep.mubr.f32.mxu1 %v3619_v50 }
 0x2d3   : > { %2761 = vmatmul.mubr.f32.vlgmr.msra.gmra.mrb[0].mxu1 %v3626_v56 }
 0x2d4   : > { %2763 = vmatprep.mubr.f32.mxu1 %v3628_v57 }
 0x2d7   : > { %2764 = vmatmul.mubr.f32.gmra.mrb[2].mxu1 %v3644_v4 }
 0x2d8   : > { %2766 = vmatprep.mubr.f32.mxu1 %v3646_v5 }
 0x2db   : > { %2767 = vmatmul.mubr.f32.gmra.mrb[4].mxu1 %v3664_v32 }
 0x2dc   : > { %2769 = vmatprep.mubr.f32.mxu1 %v3666_v34 }
 0x2df   : > { %2770 = vmatmul.mubr.f32.gmra.mrb[6].mxu1 %v3684_v24 }
 0x2e0   : > { %2772 = vmatprep.mubr.f32.mxu1 %v3686_v25 }
 0x2e3   : > { %2773 = vmatmul.mubr.f32.gmra.mrb[8].mxu1 %v3698_v44 }
 0x3a6   : > { %v2762_v27 = vpop.f32.mrb[0].mxu1 }
 0x3a7   : > { %v2149_v46 = vpop.f32.mrb[1].mxu1  ;;  %v2214_v47 = vmul.f32 %v2762_v27, %v2762_v27 }
 0x3a8   : > { %v2213_v50 = vmul.f32 %v2149_v46, %v2149_v46 }
 0x3a9   : > { %v2216_v59 = vmul.f32 0.012345679, %v2214_v47 }
 0x3aa   : > { %v2765_v51 = vpop.f32.mrb[2].mxu1  ;;  %v2215_v0 = vmul.f32 0.012345679, %v2213_v50 }
 0x3ab   : > { %v2208_v56 = vmul.f32 %v2765_v51, %v2762_v27  ;;  %v2161_v57 = vpop.f32.mrb[3].mxu1  ;;  %v2220_v60 = vmul.f32 %v2765_v51, %v2765_v51 }
 0x3ac   : > { %v2207_v58 = vmul.f32 %v2161_v57, %v2149_v46  ;;  %v2219_v1 = vmul.f32 %v2161_v57, %v2161_v57 }
 0x3ad   : > { %v2222_v6 = vmul.f32 0.012345679, %v2220_v60  ;;  %v2210_v13 = vmul.f32 0.012345679, %v2208_v56 }
 0x3ae   : > { %v2768_v2 = vpop.f32.mrb[4].mxu1  ;;  %v2221_v7 = vmul.f32 0.012345679, %v2219_v1  ;;  %v2209_v21 = vmul.f32 0.012345679, %v2207_v58 }
 0x3af   : > { %v2218_v3 = vsub.f32 %v2768_v2, %v2216_v59  ;;  %v2173_v4 = vpop.f32.mrb[5].mxu1 }
 0x3b0   : > { %v2217_v5 = vsub.f32 %v2173_v4, %v2215_v0 }
 0x3b2   : > { %v2771_v8 = vpop.f32.mrb[6].mxu1 }
 0x3b3   : > { %v2224_v9 = vsub.f32 %v2771_v8, %v2222_v6  ;;  %v2185_v10 = vpop.f32.mrb[7].mxu1 }
 0x3b4   : > { %v2223_v12 = vsub.f32 %v2185_v10, %v2221_v7 }
 0x3b5   : > { %v2228_v20 = vmul.f32 %v2224_v9, %v2218_v3 }
 0x3b6   : > { %v2227_v29 = vmul.f32 %v2223_v12, %v2217_v5  ;;  %v2774_v31 = vpop.f32.mrb[8].mxu1 }
 0x3b7   : > { %v2230_v32 = vadd.f32 1e-05, %v2228_v20  ;;  %v2212_v34 = vsub.f32 %v2774_v31, %v2210_v13  ;;  %v2197_v37 = vpop.f32.mrb[9].mxu1 }
 0x3b8   : > { %v2229_v38 = vadd.f32 1e-05, %v2227_v29  ;;  %v2211_v39 = vsub.f32 %v2197_v37, %v2209_v21 }
 0x3b9   : > { %3000 = vrcp.f32 %v2230_v32  ;;  %v2226_v14 = vmul.f32 %v2212_v34, %v2212_v34 }
 0x3ba   : > { %3002 = vrcp.f32 %v2229_v38  ;;  %v2225_v15 = vmul.f32 %v2211_v39, %v2211_v39 }
 0x3c3   : > { %v3001_v11 = vpop.eup %3000 }
 0x3c4   : > { %v3003_v16 = vpop.eup %3002  ;;  %v2234_v17 = vmul.f32 %v3001_v11, %v2226_v14 }
 0x3c5   : > { %v2233_v18 = vmul.f32 %v3003_v16, %v2225_v15 }
 0x3c6   : > { %v2236_v19 = vsel %vm294_vm0, %v2234_v17, 0.0 }
 0x3c7   : > { %v2235_v22 = vsel %vm294_vm0, %v2233_v18, 0.0 }
 0x3c8   : > { %v2237_v23 = vadd.f32 %v2236_v19, %v2235_v22 }
 0x3ca   : > { %2238 = vadd.xlane.f32.xlu1 %v2237_v23 }
 0x457   : > { %v2239_v24 = vpop.xlane.xlu1 %2238 }
 0x458   : > { %v2240_v25 = vrot.slane %v2239_v24, 4 }
 0x45a   : > { %v2241_v26 = vadd.f32 %v2240_v25, %v2239_v24 }
 0x45c   : > { %v2242_v28 = vrot.slane %v2241_v26, 2 }
 0x45e   : > { %v2243_v30 = vadd.f32 %v2242_v28, %v2241_v26 }
 0x460   : > { %v2244_v33 = vrot.slane %v2243_v30, 1 }
 0x462   : > { %v2245_v35 = vadd.f32 %v2244_v33, %v2243_v30 }
 0x464   : > { %2923 = vpush %v2245_v35 }
 0x495   : > { %s2924_s24 = spop %2923 }
 0x496   : > { %v2254_v42 = vstv %s2924_s24 }
 0x497   : > { %v2255_v43 = vsel %vm2253_vm3, %v2254_v42, 0.0 }
 0x498   : > { %2256 = vst [vmem:[%s279_s2] sm:$0xff] %v2255_v43 }
 0x499   : > { %3133 = shalt.err (!%p3130_p6)
}
 0x49a   : > { %s3134_s13 = scalar_lea.hbm %s3766_s25, 128  ;;  %s3138_s9 = scalar_lea.hbm %s3814_s4, 256 }
 0x49b   : > { %p3135_p1 = scmp.ne.s32.totalorder %s3766_s25, %s3134_s13  ;;  %p3139_p13 = scmp.lt.u32.totalorder %s3766_s25, %s3814_s4 }
 0x49c   : > { %p3140_p3 = scmp.lt.u32.totalorder %s3138_s9, %s3134_s13  ;;  %p3142_p7 = scmp.lt.u32.totalorder %s3134_s13, %s3766_s25 }
 0x49d   : > { %p3136_p2 = pnand %p3135_p1, %p3855_p9 }
 0x49e   : > { %p3141_p12 = por %p3140_p3, %p3139_p13 }
 0x49f   : > { %p3137_p5 = pneg %p3136_p2 }
 0x4a0   : > { %p3143_p0 = por %p3142_p7, %p3141_p12 }
 0x4a2   : > { %p3144_p11 = pnand %p3143_p0, %p3137_p5 }
 0x4a4   : > { %3147 = shalt.err (!%p3144_p11)
}
 0x4a5   : > { %2937 = dma.vmem_to_hbm [thread:$0]  (%p3855_p9), %s3768_s17, 128, %s3766_s25, %s2258_s7  }
 0x4a6 PF: > { %s2283_s30 = sand.u32 1, %s3182_s15   ;;  %p3856_p8 = scmp.ne.s32.totalorder %s3834_s28, 0 }
 0x4a7   : > { %p3857_p10 = scmp.ge.s32.totalorder %s3194_s18, 2  ;;  %s2284_s12 = scalar_lea.sflag [#allocation4], %s2283_s30 }
 0x4a9   : > { %p2954_p4 = pnand %p3857_p10, %p3856_p8 }
 0x4ab   : > { %3177 = dma.done.wait (!%p2954_p4), %s2284_s12, 128  }
 0x4ac   : > { %3179 = vsyncadd (!%p2954_p4), %s2284_s12, 4294967168  ;;  %s3858_s10 = sld [smem:[#allocation14_spill]]  ;;  %s3859_s17 = sld [smem:[#allocation15_spill]] }
 0x4ad   : > { %p16_p6 = scmp.ge.s32.totalorder %s3253_s21, 4   ;;  %s3860_s15 = smov %s3186_s16 }
 0x4ae   : > { %s3862_s18 = smov %s3253_s21 }
 0x4af   :  { %18 = sbr.rel (!%p16_p6) target bundleno = 8 (0x8), region = 99 }
 0x4b2   : > { %s3861_s16 = smov %s3858_s10 }
 0x4b6   :  { %2289 = vsyncpa [#allocation3], 1 }
 0x4b7   :  { %2291 = vsyncpa [#allocation3 + $0x1], 1 }
 0x4b8   :  { %2292 = vsyncpa [#allocation6], 1 }
 0x4b9   :  { %2293 = vsyncpa [#allocation4], 1 }
 0x4ba   :  { %2295 = vsyncpa [#allocation4 + $0x1], 1 }

</bundles_post_ra>
